<compile_context>
chip_gen: v7x
topology: tpu7x:2x2x1
jax: 0.10.0
libtpu: 0.0.40
codegen_flags: <defaults>
</compile_context>

<pallas_src>
import jax
import jax.numpy as jnp
from jax.experimental import pallas as pl
from jax.experimental.pallas import tpu as pltpu


# --------------------------------------------------------------------------- #
# Pallas kernel: transposed conv-as-matmul tile with fused bias
#   a_ref : (1, K, ts)   patch columns for one batch / one spatial tile
#   w_ref : (Cout, K)    flattened Conv3d weight (resident across the grid)
#   b_ref : (Cout, 1)    bias
#   o_ref : (1, Cout, ts) lane-dense output tile (ts is a multiple of 128 or full S)
# --------------------------------------------------------------------------- #
def _conv_kernel(a_ref, w_ref, b_ref, o_ref):
    acc = jnp.dot(w_ref[...], a_ref[0], preferred_element_type=jnp.float32)
    o_ref[0] = (acc + b_ref[...]).astype(o_ref.dtype)   # minimal f32 epilogue (v5e-friendly)


def _pick_spatial_tile(S, K, vmem_budget_bytes):
    """Largest multiple of 128 dividing S whose double-buffered A tile fits the budget."""
    cap = max(128, vmem_budget_bytes // (2 * K * 4))   # 2 pipeline buffers of (K, ts) f32
    ts = min(S, cap)
    ts -= ts % 128
    while ts >= 128:
        if S % ts == 0:
            return ts
        ts -= 128
    return S   # small / awkward S: full-extent block (always legal)


def conv_matmul_t(a, w2, b2, *, vmem_budget_bytes=6 << 20):
    """a: (N, K, S) patches, w2: (Cout, K), b2: (Cout, 1) -> (N, Cout, S) f32."""
    N, K, S = a.shape
    Cout = w2.shape[0]
    ts = _pick_spatial_tile(S, K, vmem_budget_bytes)
    grid = (N, S // ts)

    cost = pl.CostEstimate(
        flops=2 * N * S * K * Cout,
        transcendentals=0,
        bytes_accessed=4 * (a.size + w2.size + b2.size + N * Cout * S),
    )

    return pl.pallas_call(
        _conv_kernel,
        out_shape=jax.ShapeDtypeStruct((N, Cout, S), jnp.float32),
        grid_spec=pltpu.PrefetchScalarGridSpec(
            num_scalar_prefetch=0,
            grid=grid,
            in_specs=[
                pl.BlockSpec((1, K, ts), lambda n, s: (n, 0, s)),   # patches tile
                pl.BlockSpec((Cout, K), lambda n, s: (0, 0)),       # weights (resident)
                pl.BlockSpec((Cout, 1), lambda n, s: (0, 0)),       # bias (resident)
            ],
            out_specs=pl.BlockSpec((1, Cout, ts), lambda n, s: (n, 0, s)),
        ),
        compiler_params=pltpu.CompilerParams(
            dimension_semantics=("parallel", "parallel")),
        cost_estimate=cost,
    )(a, w2, b2)


def conv_deconv3d(x, weight, bias, stride, padding):
    """Equivalent of F.interpolate(conv3d(x), size=x.shape[-3:], mode='nearest')."""
    N, Cin, D, H, W = x.shape
    Cout, _, kd, kh, kw = weight.shape
    sd, sh, sw = stride
    pd, ph, pw = padding

    Do = (D + 2 * pd - kd) // sd + 1
    Ho = (H + 2 * ph - kh) // sh + 1
    Wo = (W + 2 * pw - kw) // sw + 1
    S = Do * Ho * Wo
    K = Cin * kd * kh * kw

    # Patch extraction: one fused XLA gather.  Output feature dim is channel-major
    # (cin*kvol + flat_tap), matching torch weight.reshape(Cout, -1); output layout
    # (N, K, Do, Ho, Wo) reshapes (trailing-dim merge only) into the (N, K, S)
    # matrix the kernel wants — no explicit transpose, no K/M padding passes.
    patches = jax.lax.conv_general_dilated_patches(
        x, (kd, kh, kw), (sd, sh, sw),
        [(pd, pd), (ph, ph), (pw, pw)],
        dimension_numbers=("NCDHW", "OIDHW", "NCDHW"),
    ).reshape(N, K, S)

    w2 = weight.reshape(Cout, K)
    b2 = bias.reshape(Cout, 1)

    conv_out = conv_matmul_t(patches, w2, b2)          # (N, Cout, S): already NCDHW-flat

    # Nearest-neighbor upsample to the input spatial size: one fused take along the
    # flattened spatial axis (PyTorch legacy 'nearest': src = floor(dst*in/out)).
    d_src = (jnp.arange(D) * Do) // D
    h_src = (jnp.arange(H) * Ho) // H
    w_src = (jnp.arange(W) * Wo) // W
    flat_idx = ((d_src[:, None, None] * Ho + h_src[None, :, None]) * Wo
                + w_src[None, None, :]).reshape(-1)
    y = jnp.take(conv_out, flat_idx, axis=2).reshape(N, Cout, D, H, W)
    return y


if __name__ == "__main__":
    key = jax.random.PRNGKey(0)
    N, Cin, Cout = 2, 4, 8
    D, H, W = 8, 16, 16
    k, s, p = 3, 2, 1   # Conv3d(Cin, Cout, kernel_size=3, stride=2, padding=1)

    k1, k2, k3 = jax.random.split(key, 3)
    x = jax.random.normal(k1, (N, Cin, D, H, W), jnp.float32)
    fan_in = Cin * k * k * k
    bound = 1.0 / (fan_in ** 0.5)  # deterministic init matching Conv3d default scale
    weight = jax.random.uniform(k2, (Cout, Cin, k, k, k), jnp.float32, -bound, bound)
    bias = jax.random.uniform(k3, (Cout,), jnp.float32, -bound, bound)

    fwd = jax.jit(conv_deconv3d, static_argnums=(3, 4))
    y = fwd(x, weight, bias, (s, s, s), (p, p, p))
    y = jax.block_until_ready(y)

    # reference: XLA conv + nearest gather
    ref_conv = jax.lax.conv_general_dilated(
        x, weight, window_strides=(s, s, s),
        padding=[(p, p)] * 3,
        dimension_numbers=("NCDHW", "OIDHW", "NCDHW"),
    ) + bias.reshape(1, -1, 1, 1, 1)
    Do, Ho, Wo = ref_conv.shape[-3:]
    d_idx = (jnp.arange(D) * Do) // D
    h_idx = (jnp.arange(H) * Ho) // H
    w_idx = (jnp.arange(W) * Wo) // W
    ref = ref_conv[:, :, d_idx][:, :, :, h_idx][:, :, :, :, w_idx]

    assert y.shape == (N, Cout, D, H, W)
    assert jnp.allclose(y, ref, rtol=1e-4, atol=1e-4)
    print("KERNEL_OK")
</pallas_src>

<mosaic_0001>
module attributes {stable_mosaic.version = 11 : i64} {
  func.func @_conv_kernel(%arg0: i32, %arg1: i32, %arg2: memref<1x108x256xf32, #tpu.memory_space<vmem>>, %arg3: memref<8x108xf32, #tpu.memory_space<vmem>>, %arg4: memref<8x1xf32, #tpu.memory_space<vmem>>, %arg5: memref<1x8x256xf32, #tpu.memory_space<vmem>>) attributes {dimension_semantics = [#tpu.dimension_semantics<parallel>, #tpu.dimension_semantics<parallel>], iteration_bounds = array<i64: 2, 1>, scalar_prefetch = 0 : i64, scratch_operands = 0 : i64, tpu.core_type = #tpu.core_type<tc>, window_params = [{transform_indices = @transform_0, window_bounds = array<i64: 1, 108, 256>}, {pipeline_mode = #tpu.pipeline_mode<synchronous>, transform_indices = @transform_1, window_bounds = array<i64: 8, 108>}, {pipeline_mode = #tpu.pipeline_mode<synchronous>, transform_indices = @transform_2, window_bounds = array<i64: 8, 1>}, {transform_indices = @transform_3, window_bounds = array<i64: 1, 8, 256>}]} {
    %c0 = arith.constant 0 : index
    %c0_0 = arith.constant 0 : index
    %0 = vector.load %arg3[%c0, %c0_0] : memref<8x108xf32, #tpu.memory_space<vmem>>, vector<8x108xf32>
    %c0_1 = arith.constant 0 : index
    %c0_2 = arith.constant 0 : index
    %c0_3 = arith.constant 0 : index
    %1 = vector.load %arg2[%c0_1, %c0_2, %c0_3] : memref<1x108x256xf32, #tpu.memory_space<vmem>>, vector<1x108x256xf32>
    %2 = vector.shape_cast %1 : vector<1x108x256xf32> to vector<108x256xf32>
    %cst = arith.constant dense<0.000000e+00> : vector<8x256xf32>
    %3 = tpu.matmul %0, %2, %cst {dimension_numbers = #tpu.dot_dimension_numbers<[1], [0], [0], [1], [0, 0, 1, 1], [], []>} : vector<8x108xf32>, vector<108x256xf32>, vector<8x256xf32> -> vector<8x256xf32>
    %c0_4 = arith.constant 0 : index
    %c0_5 = arith.constant 0 : index
    %4 = vector.load %arg4[%c0_4, %c0_5] : memref<8x1xf32, #tpu.memory_space<vmem>>, vector<8x1xf32>
    %5 = vector.broadcast %4 : vector<8x1xf32> to vector<8x256xf32>
    %6 = arith.addf %3, %5 : vector<8x256xf32>
    %c0_6 = arith.constant 0 : index
    %c0_7 = arith.constant 0 : index
    %c0_8 = arith.constant 0 : index
    %7 = vector.load %arg5[%c0_6, %c0_7, %c0_8] : memref<1x8x256xf32, #tpu.memory_space<vmem>>, vector<1x8x256xf32>
    %8 = vector.shape_cast %7 : vector<1x8x256xf32> to vector<8x256xf32>
    %9 = vector.shape_cast %6 : vector<8x256xf32> to vector<1x8x256xf32>
    tpu.vector_store %arg5[%c0_6, %c0_7, %c0_8], %9 {strides = array<i32>} : memref<1x8x256xf32, #tpu.memory_space<vmem>>, vector<1x8x256xf32>,
    return
  }
  func.func @transform_0(%arg0: i32, %arg1: i32) -> (i32, i32, i32) {
    %c0_i32 = arith.constant 0 : i32
    %c0_i32_0 = arith.constant 0 : i32
    return %arg0, %c0_i32, %arg1 : i32, i32, i32
  }
  func.func @transform_1(%arg0: i32, %arg1: i32) -> (i32, i32) {
    %c0_i32 = arith.constant 0 : i32
    %c0_i32_0 = arith.constant 0 : i32
    %c0_i32_1 = arith.constant 0 : i32
    return %c0_i32, %c0_i32_0 : i32, i32
  }
  func.func @transform_2(%arg0: i32, %arg1: i32) -> (i32, i32) {
    %c0_i32 = arith.constant 0 : i32
    %c0_i32_0 = arith.constant 0 : i32
    %c0_i32_1 = arith.constant 0 : i32
    return %c0_i32, %c0_i32_0 : i32, i32
  }
  func.func @transform_3(%arg0: i32, %arg1: i32) -> (i32, i32, i32) {
    %c0_i32 = arith.constant 0 : i32
    %c0_i32_0 = arith.constant 0 : i32
    return %arg0, %c0_i32, %arg1 : i32, i32, i32
  }
}

</mosaic_0001>

<bundles_post_ra>
// kernel: conv_deconv3d.1
= control target key start
LH: loop header
LB: loop body
LE: loop exit
PB: predicated region body
PF: predicated region fallthrough
CT: control target
= control target key end

     0   :  { %s536_s12 = smov 0   ;;  %s538_s13 = smov 0   ;;  %s609_s0 = inlined_call_operand.vmem [shape: f32[2,108,256], index: 0, kind: input, shape index: {}]   ;;  %s610_s1 = inlined_call_operand.vmem [shape: f32[8,108], index: 1, kind: input, shape index: {}]   ;;  %s611_s2 = inlined_call_operand.vmem [shape: f32[8,1], index: 2, kind: input, shape index: {}]   ;;  %s612_s3 = inlined_call_operand.vmem [shape: f32[2,8,256], index: 3, kind: output, shape index: {}]  }
   0x1   :  { %s540_s14 = smov 0  }
   0x2 LB: > { %s25_s15 = sadd.s32 1, %s507_s13  ;;  %p420_p0 = scmp.ge.s32.totalorder %s511_s14, 1  ;;  %s511_s14 = sphi %s540_s14, %s13_s14   ;;  %s507_s13 = sphi %s538_s13, %s614_s13   ;;  %s503_s12 = sphi %s536_s12, %s613_s12  }
   0x3   : > { %p27_p1 = scmp.ge.s32.totalorder %s25_s15, 2  ;;  %p158_p2 = scmp.lt.s32.totalorder %s511_s14, 3 }
   0x5   : > { %s616_s15 = smov (%p27_p1, %s25_s15), 0  ;;  %p159_p3 = pnand %p420_p0, %p158_p2 }
   0x6   : > { %p191_p4 = scmp.lt.s32.totalorder (!%p159_p3), %s503_s12, 1  ;;  %v513_v0 = vmov (!%p159_p3), 0.0   ;;  %v239_v1 = vld [vmem:[%s611_s2] sm:$0xff] (!%p159_p3)  ;;  %v514_v2 = vmov (!%p159_p3), 0   ;;  %vm249_vm0 = vcmask (!%p159_p3), 1043456   ;;  %vm515_vm1 = vmmov (!%p159_p3), 1  }
   0x7   : > { %162 = sbr.rel (%p159_p3) target bundleno = 265 (0x109), region = 32  ;;  %320 = vmatprep.mubr.f32.mxu0 (!%p159_p3), %v513_v0  ;;  %488 = vset.pattern.permute.xlu0 (!%p159_p3), %v514_v2  ;;  %vm455_vm2 = vmpackc.low (!%p159_p3), %vm249_vm0, %vm515_vm1  ;;  %v210_v45 = vld [vmem:[%s610_s1] sm:$0xff] (!%p159_p3)  ;;  %vm245_vm3 = vcmask (!%p159_p3), 883712  }
   0x8   : > { %242 = vperm.xlu0 (!%p159_p3), %488, %v239_v1  }
   0xe   : > { %s618_s12 = smov (!%p191_p4, %s503_s12), 1 }
   0xf   : > { %s460_s18 = smul.u32 224, %s618_s12  ;;  %s429_s24 = sshll.u32 %s618_s12, 4 }
  0x10   : > { %s208_s27 = scalar_lea.vmem %s612_s3, %s429_s24 }
  0x11   : > { %s563_s21 = scalar_lea.vmem %s609_s0, %s460_s18 }
  0x12   : > { %v212_v3 = vld [vmem:[%s563_s21 + $0x8] sm:$0xff]  ;;  %v214_v4 = vld [vmem:[%s563_s21 + $0x18] sm:$0xff]  ;;  %v211_v5 = vld [vmem:[%s563_s21] sm:$0xff] }
  0x13   : > { %v430_v6 = vpack.c.bf16 %v214_v4, %v212_v3  ;;  %v213_v7 = vld [vmem:[%s563_s21 + $0x10] sm:$0xff]  ;;  %v216_v8 = vld [vmem:[%s563_s21 + $0x28] sm:$0xff]  ;;  %v218_v9 = vld [vmem:[%s563_s21 + $0x38] sm:$0xff] }
  0x14   : > { %v432_v10 = vpack.c.bf16 %v213_v7, %v211_v5  ;;  %v434_v11 = vpack.c.bf16 %v218_v9, %v216_v8  ;;  %v215_v12 = vld [vmem:[%s563_s21 + $0x20] sm:$0xff]  ;;  %v217_v13 = vld [vmem:[%s563_s21 + $0x30] sm:$0xff]  ;;  %v220_v14 = vld [vmem:[%s563_s21 + $0x48] sm:$0xff] }
  0x15   : > { %431 = vmatprep.subr.bf16.mxu0 %v430_v6  ;;  %v222_v15 = vld [vmem:[%s563_s21 + $0x58] sm:$0xff]  ;;  %v436_v16 = vpack.c.bf16 %v217_v13, %v215_v12  ;;  %v219_v18 = vld [vmem:[%s563_s21 + $0x40] sm:$0xff]  ;;  %v221_v19 = vld [vmem:[%s563_s21 + $0x50] sm:$0xff] }
  0x16   : > { %433 = vmatpush1.bf16.msra.mxu0 %v432_v10  ;;  %v438_v17 = vpack.c.bf16 %v222_v15, %v220_v14  ;;  %v224_v20 = vld [vmem:[%s563_s21 + $0x68] sm:$0xff]  ;;  %v226_v21 = vld [vmem:[%s563_s21 + $0x78] sm:$0xff]  ;;  %v440_v22 = vpack.c.bf16 %v221_v19, %v219_v18  ;;  %v223_v24 = vld [vmem:[%s563_s21 + $0x60] sm:$0xff] }
  0x17   : > { %435 = vmatprep.subr.bf16.mxu0 %v434_v11  ;;  %v442_v23 = vpack.c.bf16 %v226_v21, %v224_v20  ;;  %v225_v25 = vld [vmem:[%s563_s21 + $0x70] sm:$0xff]  ;;  %v228_v26 = vld [vmem:[%s563_s21 + $0x88] sm:$0xff]  ;;  %v230_v27 = vld [vmem:[%s563_s21 + $0x98] sm:$0xff] }
  0x18   : > { %v444_v28 = vpack.c.bf16 %v225_v25, %v223_v24  ;;  %v446_v29 = vpack.c.bf16 %v230_v27, %v228_v26  ;;  %v227_v30 = vld [vmem:[%s563_s21 + $0x80] sm:$0xff]  ;;  %v229_v31 = vld [vmem:[%s563_s21 + $0x90] sm:$0xff]  ;;  %v232_v32 = vld [vmem:[%s563_s21 + $0xa8] sm:$0xff] }
  0x19   : > { %v234_v33 = vld [vmem:[%s563_s21 + $0xb8] sm:$0xff]  ;;  %v448_v34 = vpack.c.bf16 %v229_v31, %v227_v30  ;;  %v231_v36 = vld [vmem:[%s563_s21 + $0xa0] sm:$0xff]  ;;  %v233_v37 = vld [vmem:[%s563_s21 + $0xb0] sm:$0xff] }
  0x1a   : > { %437 = vmatpush1.bf16.msra.mxu0 %v436_v16  ;;  %v450_v35 = vpack.c.bf16 %v234_v33, %v232_v32  ;;  %v236_v38 = vld [vmem:[%s563_s21 + $0xc8] sm:$0xff]  ;;  %v238_v39 = vld [vmem:[%s563_s21 + $0xd8] sm:$0xf]  ;;  %v452_v40 = vpack.c.bf16 %v233_v37, %v231_v36  ;;  %v235_v42 = vld [vmem:[%s563_s21 + $0xc0] sm:$0xff] }
  0x1b   : > { %439 = vmatprep.subr.bf16.mxu0 %v438_v17  ;;  %v454_v41 = vpack.c.bf16 %v238_v39, %v236_v38  ;;  %v237_v43 = vld [vmem:[%s563_s21 + $0xd0] sm:$0xf] }
  0x1c   : > { %v457_v44 = vpack.c.bf16 %v237_v43, %v235_v42 }
  0x1e   : > { %441 = vmatpush1.bf16.msra.mxu0 %v440_v22 }
  0x1f   : > { %443 = vmatprep.subr.bf16.mxu0 %v442_v23 }
  0x22   : > { %445 = vmatpush1.bf16.msra.mxu0 %v444_v28 }
  0x23   : > { %447 = vmatprep.subr.bf16.mxu0 %v446_v29 }
  0x26   : > { %449 = vmatpush1.bf16.msra.mxu0 %v448_v34 }
  0x27   : > { %451 = vmatprep.subr.bf16.mxu0 %v450_v35 }
  0x2a   : > { %453 = vmatpush1.bf16.msra.mxu0 %v452_v40 }
  0x2b   : > { %456 = vmatprep.subr.msk.bf16.mxu0 %vm455_vm2, %v454_v41 }
  0x2e   : > { %459 = vmatpush1.bf16.msk.msra.mxu0 %vm455_vm2, %v457_v44 }
  0x31   : > { %426 = vmatmul.mubr.msk.f32.vlgmr.msra.gmra.mrb[0].mxu0 %vm245_vm3, %v210_v45 }
  0x87   : > { %v243_v46 = vpop.permute.xlu0 %242 }
 0x104   : > { %v322_v47 = vpop.f32.mrb[0].mxu0 }
 0x105   : > { %v323_v48 = vadd.f32 %v322_v47, %v243_v46  ;;  %v324_v49 = vpop.f32.mrb[1].mxu0 }
 0x106   : > { %v325_v50 = vadd.f32 %v324_v49, %v243_v46 }
 0x107   : > { %327 = vst [vmem:[%s208_s27] sm:$0xff] %v323_v48 }
 0x108   : > { %328 = vst [vmem:[%s208_s27 + $0x8] sm:$0xff] %v325_v50 }
 0x109 PF: > { %s13_s14 = sadd.s32 1, %s511_s14   ;;  %s613_s12 = smov %s507_s13 }
 0x10a   : > { %p10_p5 = scmp.ge.s32.totalorder %s13_s14, 4   ;;  %s614_s13 = smov %s616_s15 }
 0x10c   :  { %12 = sbr.rel (!%p10_p5) target bundleno = 2 (0x2), region = 62 }

</bundles_post_ra>
